<compile_context>
chip_gen: v5e
topology: v5e:2x2
jax: 0.10.0
libtpu: 0.0.40
codegen_flags: <defaults>
</compile_context>

<pallas_src>
import jax
import jax.numpy as jnp
from jax.experimental import pallas as pl
from jax.experimental.pallas import tpu as pltpu

_LANE = 128
_MIN_ROWS_PER_SPLIT = 512     # only force a >=2-step grid once each step keeps this many rows


def _round_up(x, m):
    return (x + m - 1) // m * m


# --------------------------------------------------------------------------- #
# Kernel
# --------------------------------------------------------------------------- #
def _mlp_kernel(x_ref,
                w1_ref, b1_ref,
                w2_ref, b2_ref,
                w3_ref, b3_ref,
                wh_ref, bh_ref,
                out_ref):
    # x arrives as f32 from HBM; cast to bf16 in-kernel (VPU, hidden under DMA/MXU).
    x = x_ref[...].astype(jnp.bfloat16)

    # fc1 + relu   (bf16 operands, f32 MXU accumulation; elementwise in f32)
    h = jnp.dot(x, w1_ref[...], preferred_element_type=jnp.float32) + b1_ref[...]
    h = jnp.maximum(h, 0.0)
    # fc2 + relu
    h = jnp.dot(h.astype(jnp.bfloat16), w2_ref[...],
                preferred_element_type=jnp.float32) + b2_ref[...]
    h = jnp.maximum(h, 0.0)
    # fc3 + relu  (64-wide intermediate; no lane padding needed for vreg values)
    h = jnp.dot(h.astype(jnp.bfloat16), w3_ref[...],
                preferred_element_type=jnp.float32) + b3_ref[...]
    h = jnp.maximum(h, 0.0)

    # fused heads: one lane-dense (TB, 128) matmul covering cls | contact | keyframe
    head = jnp.dot(h.astype(jnp.bfloat16), wh_ref[...],
                   preferred_element_type=jnp.float32) + bh_ref[...]

    # unmasked, lane-dense bf16 store (halves output HBM traffic vs f32)
    out_ref[...] = head.astype(out_ref.dtype)


# --------------------------------------------------------------------------- #
# Parameters
# --------------------------------------------------------------------------- #
def init_params(key, input_size=256, num_classes=7, key_frame_output_size=7):
    """PyTorch nn.Linear-style init: U(-1/sqrt(fan_in), 1/sqrt(fan_in)).
    Weights stored transposed as (in_features, out_features); biases as (1, out)."""
    dims = [
        ("w1", "b1", input_size, 128),
        ("w2", "b2", 128, 256),
        ("w3", "b3", 256, 64),
        ("wc", "bc", 64, num_classes),
        ("wci", "bci", 64, 1),
        ("wk", "bk", 64, key_frame_output_size),
    ]
    params = {}
    keys = jax.random.split(key, 2 * len(dims))
    for i, (wname, bname, fin, fout) in enumerate(dims):
        bound = 1.0 / jnp.sqrt(jnp.float32(fin))
        params[wname] = jax.random.uniform(
            keys[2 * i], (fin, fout), jnp.float32, -bound, bound)
        params[bname] = jax.random.uniform(
            keys[2 * i + 1], (1, fout), jnp.float32, -bound, bound)
    return params


def pack_params(params):
    """Fuse + lane-pad the three heads into one (64, 128) weight; cast matmul
    weights to bf16 (biases stay f32)."""
    num_classes = params["wc"].shape[1]
    kf = params["wk"].shape[1]
    h3 = params["w3"].shape[1]                        # 64
    head_width = num_classes + 1 + kf                 # 15
    head_pad = _round_up(head_width, _LANE)           # 128
    assert head_width <= _LANE, "fused head wider than one lane group"
    assert num_classes < head_width                   # contact column exists

    wh = jnp.zeros((h3, head_pad), jnp.float32)
    wh = wh.at[:, :num_classes].set(params["wc"])
    wh = wh.at[:, num_classes:num_classes + 1].set(params["wci"])
    wh = wh.at[:, num_classes + 1:head_width].set(params["wk"])
    bh = jnp.zeros((1, head_pad), jnp.float32)
    bh = bh.at[:, :num_classes].set(params["bc"])
    bh = bh.at[:, num_classes:num_classes + 1].set(params["bci"])
    bh = bh.at[:, num_classes + 1:head_width].set(params["bk"])

    return dict(
        w1=params["w1"].astype(jnp.bfloat16), b1=params["b1"].astype(jnp.float32),
        w2=params["w2"].astype(jnp.bfloat16), b2=params["b2"].astype(jnp.float32),
        w3=params["w3"].astype(jnp.bfloat16), b3=params["b3"].astype(jnp.float32),
        wh=wh.astype(jnp.bfloat16), bh=bh,
        num_classes=num_classes, key_frame_output_size=kf,
        head_width=head_width, head_pad=head_pad,
    )


# --------------------------------------------------------------------------- #
# Wrapper
# --------------------------------------------------------------------------- #
def _choose_batch_tile(batch, max_tile_rows):
    """Tile rows so (a) padding waste < 8 rows per step and (b) large batches
    always give an even number (>=2) of grid steps for v7x's two TensorCores."""
    n_tiles = max(1, pl.cdiv(batch, max_tile_rows))
    if batch >= 2 * _MIN_ROWS_PER_SPLIT:
        n_tiles = _round_up(max(n_tiles, 2), 2)
    return _round_up(pl.cdiv(batch, n_tiles), 8)


def _resident_pipeline_modes():
    modes = []
    try:
        # Resident blocks never change -> a single pipeline buffer is enough.
        modes.append(pl.Buffered(1))
    except Exception:
        pass
    modes.append(None)
    return tuple(modes)


def _run_pallas(x, packed, TB, B_pad, in_features, head_pad, cost, resident_mode):
    stream = lambda i: (i, 0)      # x / out: streamed & double-buffered over batch
    resident = lambda i: (0, 0)    # weights/biases: same block every step -> VMEM-resident

    def res_spec(shape):
        if resident_mode is None:
            return pl.BlockSpec(shape, resident)
        return pl.BlockSpec(shape, resident, pipeline_mode=resident_mode)

    in_specs = [
        pl.BlockSpec((TB, in_features), stream),
        res_spec(packed["w1"].shape), res_spec(packed["b1"].shape),
        res_spec(packed["w2"].shape), res_spec(packed["b2"].shape),
        res_spec(packed["w3"].shape), res_spec(packed["b3"].shape),
        res_spec(packed["wh"].shape), res_spec(packed["bh"].shape),
    ]
    out_spec = pl.BlockSpec((TB, head_pad), stream)

    return pl.pallas_call(
        _mlp_kernel,
        out_shape=jax.ShapeDtypeStruct((B_pad, head_pad), jnp.bfloat16),
        grid=(B_pad // TB,),
        in_specs=in_specs,
        out_specs=out_spec,
        compiler_params=pltpu.CompilerParams(
            dimension_semantics=("parallel",)),
        cost_estimate=cost,
    )(x,
      packed["w1"], packed["b1"],
      packed["w2"], packed["b2"],
      packed["w3"], packed["b3"],
      packed["wh"], packed["bh"])


def custom_network_forward(x, packed, max_tile_rows=2048):
    """x: (B, input_size) float32 (or bf16).  packed: output of pack_params()."""
    B, in_features = x.shape
    assert in_features == packed["w1"].shape[0]
    num_classes = packed["num_classes"]
    kf = packed["key_frame_output_size"]
    head_pad = packed["head_pad"]

    TB = _choose_batch_tile(B, max_tile_rows)
    B_pad = _round_up(B, TB)
    if B_pad != B:
        x = jnp.pad(x, ((0, B_pad - B), (0, 0)))

    h1 = packed["w1"].shape[1]
    h2 = packed["w2"].shape[1]
    h3 = packed["w3"].shape[1]
    flops = 2 * B_pad * (in_features * h1 + h1 * h2 + h2 * h3 + h3 * head_pad)
    weight_bytes = sum(int(packed[k].size) * packed[k].dtype.itemsize
                       for k in ("w1", "b1", "w2", "b2", "w3", "b3", "wh", "bh"))
    bytes_accessed = (B_pad * in_features * x.dtype.itemsize
                      + B_pad * head_pad * 2          # bf16 output
                      + weight_bytes)
    cost = pl.CostEstimate(flops=flops, transcendentals=0,
                           bytes_accessed=int(bytes_accessed))

    out = None
    last_err = None
    for resident_mode in _resident_pipeline_modes():
        try:
            out = _run_pallas(x, packed, TB, B_pad, in_features, head_pad,
                              cost, resident_mode)
            break
        except Exception as e:        # fall back to default double-buffered specs
            last_err = e
    if out is None:
        raise last_err

    # Slice the live columns; sigmoid only on the (B, 1) contact column (exact,
    # in f32, fuses into the slice under a consumer-side jit).
    cls = out[:B, :num_classes].astype(jnp.float32)
    contact = jax.nn.sigmoid(out[:B, num_classes:num_classes + 1].astype(jnp.float32))
    key = out[:B, num_classes + 1:num_classes + 1 + kf].astype(jnp.float32)
    return cls, contact, key


# --------------------------------------------------------------------------- #
# Pure-JAX reference (same bf16-operand / f32-accumulate contract)
# --------------------------------------------------------------------------- #
def _reference_forward(x, p):
    def mm(a, w):
        return jnp.dot(a.astype(jnp.bfloat16), w.astype(jnp.bfloat16),
                       preferred_element_type=jnp.float32)
    h = jnp.maximum(mm(x, p["w1"]) + p["b1"], 0.0)
    h = jnp.maximum(mm(h, p["w2"]) + p["b2"], 0.0)
    h = jnp.maximum(mm(h, p["w3"]) + p["b3"], 0.0)
    cls = mm(h, p["wc"]) + p["bc"]
    ci = jax.nn.sigmoid(mm(h, p["wci"]) + p["bci"])
    kfo = mm(h, p["wk"]) + p["bk"]
    return cls, ci, kfo


if __name__ == "__main__":
    key = jax.random.PRNGKey(0)
    pkey, xkey = jax.random.split(key)

    input_size = 256
    batch = 8
    num_classes = 7
    key_frame_output_size = 7

    params = init_params(pkey, input_size=input_size,
                         num_classes=num_classes,
                         key_frame_output_size=key_frame_output_size)
    packed = pack_params(params)
    x = jax.random.normal(xkey, (batch, input_size), jnp.float32)

    cls_out, contact_out, key_out = custom_network_forward(x, packed)
    jax.block_until_ready((cls_out, contact_out, key_out))

    ref = _reference_forward(x, params)
    assert cls_out.shape == (batch, num_classes)
    assert contact_out.shape == (batch, 1)
    assert key_out.shape == (batch, key_frame_output_size)
    for got, want in zip((cls_out, contact_out, key_out), ref):
        err = float(jnp.max(jnp.abs(got - want)))
        assert jnp.allclose(got, want, atol=1e-2, rtol=1e-2), err

    print("KERNEL_OK")
</pallas_src>

<mosaic_0001>
module attributes {stable_mosaic.version = 11 : i64} {
  func.func @_mlp_kernel(%arg0: i32, %arg1: memref<8x256xf32, #tpu.memory_space<vmem>>, %arg2: memref<256x128xbf16, #tpu.memory_space<vmem>>, %arg3: memref<1x128xf32, #tpu.memory_space<vmem>>, %arg4: memref<128x256xbf16, #tpu.memory_space<vmem>>, %arg5: memref<1x256xf32, #tpu.memory_space<vmem>>, %arg6: memref<256x64xbf16, #tpu.memory_space<vmem>>, %arg7: memref<1x64xf32, #tpu.memory_space<vmem>>, %arg8: memref<64x128xbf16, #tpu.memory_space<vmem>>, %arg9: memref<1x128xf32, #tpu.memory_space<vmem>>, %arg10: memref<8x128xbf16, #tpu.memory_space<vmem>>) attributes {dimension_semantics = [#tpu.dimension_semantics<parallel>], iteration_bounds = array<i64: 1>, scalar_prefetch = 0 : i64, scratch_operands = 0 : i64, tpu.core_type = #tpu.core_type<tc>, window_params = [{transform_indices = @transform_0, window_bounds = array<i64: 8, 256>}, {pipeline_mode = #tpu.pipeline_mode<synchronous>, transform_indices = @transform_1, window_bounds = array<i64: 256, 128>}, {pipeline_mode = #tpu.pipeline_mode<synchronous>, transform_indices = @transform_2, window_bounds = array<i64: 1, 128>}, {pipeline_mode = #tpu.pipeline_mode<synchronous>, transform_indices = @transform_3, window_bounds = array<i64: 128, 256>}, {pipeline_mode = #tpu.pipeline_mode<synchronous>, transform_indices = @transform_4, window_bounds = array<i64: 1, 256>}, {pipeline_mode = #tpu.pipeline_mode<synchronous>, transform_indices = @transform_5, window_bounds = array<i64: 256, 64>}, {pipeline_mode = #tpu.pipeline_mode<synchronous>, transform_indices = @transform_6, window_bounds = array<i64: 1, 64>}, {pipeline_mode = #tpu.pipeline_mode<synchronous>, transform_indices = @transform_7, window_bounds = array<i64: 64, 128>}, {pipeline_mode = #tpu.pipeline_mode<synchronous>, transform_indices = @transform_8, window_bounds = array<i64: 1, 128>}, {transform_indices = @transform_9, window_bounds = array<i64: 8, 128>}]} {
    %c0 = arith.constant 0 : index
    %c0_0 = arith.constant 0 : index
    %0 = vector.load %arg1[%c0, %c0_0] : memref<8x256xf32, #tpu.memory_space<vmem>>, vector<8x256xf32>
    %1 = arith.truncf %0 : vector<8x256xf32> to vector<8x256xbf16>
    %c0_1 = arith.constant 0 : index
    %c0_2 = arith.constant 0 : index
    %2 = vector.load %arg2[%c0_1, %c0_2] : memref<256x128xbf16, #tpu.memory_space<vmem>>, vector<256x128xbf16>
    %cst = arith.constant dense<0.000000e+00> : vector<8x128xf32>
    %3 = tpu.matmul %1, %2, %cst {dimension_numbers = #tpu.dot_dimension_numbers<[1], [0], [0], [1], [0, 0, 1, 1], [], []>} : vector<8x256xbf16>, vector<256x128xbf16>, vector<8x128xf32> -> vector<8x128xf32>
    %c0_3 = arith.constant 0 : index
    %c0_4 = arith.constant 0 : index
    %4 = vector.load %arg3[%c0_3, %c0_4] : memref<1x128xf32, #tpu.memory_space<vmem>>, vector<1x128xf32>
    %5 = vector.broadcast %4 : vector<1x128xf32> to vector<8x128xf32>
    %6 = arith.addf %3, %5 : vector<8x128xf32>
    %cst_5 = arith.constant 0.000000e+00 : f32
    %7 = vector.broadcast %cst_5 : f32 to vector<8x128xf32>
    %8 = arith.maximumf %6, %7 : vector<8x128xf32>
    %9 = arith.truncf %8 : vector<8x128xf32> to vector<8x128xbf16>
    %c0_6 = arith.constant 0 : index
    %c0_7 = arith.constant 0 : index
    %10 = vector.load %arg4[%c0_6, %c0_7] : memref<128x256xbf16, #tpu.memory_space<vmem>>, vector<128x256xbf16>
    %cst_8 = arith.constant dense<0.000000e+00> : vector<8x256xf32>
    %11 = tpu.matmul %9, %10, %cst_8 {dimension_numbers = #tpu.dot_dimension_numbers<[1], [0], [0], [1], [0, 0, 1, 1], [], []>} : vector<8x128xbf16>, vector<128x256xbf16>, vector<8x256xf32> -> vector<8x256xf32>
    %c0_9 = arith.constant 0 : index
    %c0_10 = arith.constant 0 : index
    %12 = vector.load %arg5[%c0_9, %c0_10] : memref<1x256xf32, #tpu.memory_space<vmem>>, vector<1x256xf32>
    %13 = vector.broadcast %12 : vector<1x256xf32> to vector<8x256xf32>
    %14 = arith.addf %11, %13 : vector<8x256xf32>
    %cst_11 = arith.constant 0.000000e+00 : f32
    %15 = vector.broadcast %cst_11 : f32 to vector<8x256xf32>
    %16 = arith.maximumf %14, %15 : vector<8x256xf32>
    %17 = arith.truncf %16 : vector<8x256xf32> to vector<8x256xbf16>
    %c0_12 = arith.constant 0 : index
    %c0_13 = arith.constant 0 : index
    %18 = vector.load %arg6[%c0_12, %c0_13] : memref<256x64xbf16, #tpu.memory_space<vmem>>, vector<256x64xbf16>
    %cst_14 = arith.constant dense<0.000000e+00> : vector<8x64xf32>
    %19 = tpu.matmul %17, %18, %cst_14 {dimension_numbers = #tpu.dot_dimension_numbers<[1], [0], [0], [1], [0, 0, 1, 1], [], []>} : vector<8x256xbf16>, vector<256x64xbf16>, vector<8x64xf32> -> vector<8x64xf32>
    %c0_15 = arith.constant 0 : index
    %c0_16 = arith.constant 0 : index
    %20 = vector.load %arg7[%c0_15, %c0_16] : memref<1x64xf32, #tpu.memory_space<vmem>>, vector<1x64xf32>
    %21 = vector.broadcast %20 : vector<1x64xf32> to vector<8x64xf32>
    %22 = arith.addf %19, %21 : vector<8x64xf32>
    %cst_17 = arith.constant 0.000000e+00 : f32
    %23 = vector.broadcast %cst_17 : f32 to vector<8x64xf32>
    %24 = arith.maximumf %22, %23 : vector<8x64xf32>
    %25 = arith.truncf %24 : vector<8x64xf32> to vector<8x64xbf16>
    %c0_18 = arith.constant 0 : index
    %c0_19 = arith.constant 0 : index
    %26 = vector.load %arg8[%c0_18, %c0_19] : memref<64x128xbf16, #tpu.memory_space<vmem>>, vector<64x128xbf16>
    %cst_20 = arith.constant dense<0.000000e+00> : vector<8x128xf32>
    %27 = tpu.matmul %25, %26, %cst_20 {dimension_numbers = #tpu.dot_dimension_numbers<[1], [0], [0], [1], [0, 0, 1, 1], [], []>} : vector<8x64xbf16>, vector<64x128xbf16>, vector<8x128xf32> -> vector<8x128xf32>
    %c0_21 = arith.constant 0 : index
    %c0_22 = arith.constant 0 : index
    %28 = vector.load %arg9[%c0_21, %c0_22] : memref<1x128xf32, #tpu.memory_space<vmem>>, vector<1x128xf32>
    %29 = vector.broadcast %28 : vector<1x128xf32> to vector<8x128xf32>
    %30 = arith.addf %27, %29 : vector<8x128xf32>
    %31 = arith.truncf %30 : vector<8x128xf32> to vector<8x128xbf16>
    %c0_23 = arith.constant 0 : index
    %c0_24 = arith.constant 0 : index
    %32 = vector.load %arg10[%c0_23, %c0_24] : memref<8x128xbf16, #tpu.memory_space<vmem>>, vector<8x128xbf16>
    tpu.vector_store %arg10[%c0_23, %c0_24], %31 {strides = array<i32>} : memref<8x128xbf16, #tpu.memory_space<vmem>>, vector<8x128xbf16>,
    return
  }
  func.func @transform_0(%arg0: i32) -> (i32, i32) {
    %c0_i32 = arith.constant 0 : i32
    %c0_i32_0 = arith.constant 0 : i32
    return %arg0, %c0_i32 : i32, i32
  }
  func.func @transform_1(%arg0: i32) -> (i32, i32) {
    %c0_i32 = arith.constant 0 : i32
    %c0_i32_0 = arith.constant 0 : i32
    %c0_i32_1 = arith.constant 0 : i32
    return %c0_i32, %c0_i32_0 : i32, i32
  }
  func.func @transform_2(%arg0: i32) -> (i32, i32) {
    %c0_i32 = arith.constant 0 : i32
    %c0_i32_0 = arith.constant 0 : i32
    %c0_i32_1 = arith.constant 0 : i32
    return %c0_i32, %c0_i32_0 : i32, i32
  }
  func.func @transform_3(%arg0: i32) -> (i32, i32) {
    %c0_i32 = arith.constant 0 : i32
    %c0_i32_0 = arith.constant 0 : i32
    %c0_i32_1 = arith.constant 0 : i32
    return %c0_i32, %c0_i32_0 : i32, i32
  }
  func.func @transform_4(%arg0: i32) -> (i32, i32) {
    %c0_i32 = arith.constant 0 : i32
    %c0_i32_0 = arith.constant 0 : i32
    %c0_i32_1 = arith.constant 0 : i32
    return %c0_i32, %c0_i32_0 : i32, i32
  }
  func.func @transform_5(%arg0: i32) -> (i32, i32) {
    %c0_i32 = arith.constant 0 : i32
    %c0_i32_0 = arith.constant 0 : i32
    %c0_i32_1 = arith.constant 0 : i32
    return %c0_i32, %c0_i32_0 : i32, i32
  }
  func.func @transform_6(%arg0: i32) -> (i32, i32) {
    %c0_i32 = arith.constant 0 : i32
    %c0_i32_0 = arith.constant 0 : i32
    %c0_i32_1 = arith.constant 0 : i32
    return %c0_i32, %c0_i32_0 : i32, i32
  }
  func.func @transform_7(%arg0: i32) -> (i32, i32) {
    %c0_i32 = arith.constant 0 : i32
    %c0_i32_0 = arith.constant 0 : i32
    %c0_i32_1 = arith.constant 0 : i32
    return %c0_i32, %c0_i32_0 : i32, i32
  }
  func.func @transform_8(%arg0: i32) -> (i32, i32) {
    %c0_i32 = arith.constant 0 : i32
    %c0_i32_0 = arith.constant 0 : i32
    %c0_i32_1 = arith.constant 0 : i32
    return %c0_i32, %c0_i32_0 : i32, i32
  }
  func.func @transform_9(%arg0: i32) -> (i32, i32) {
    %c0_i32 = arith.constant 0 : i32
    %c0_i32_0 = arith.constant 0 : i32
    return %arg0, %c0_i32 : i32, i32
  }
}

module attributes {stable_mosaic.version = 11 : i64} {
  func.func @_mlp_kernel(%arg0: i32, %arg1: memref<8x256xf32, #tpu.memory_space<vmem>>, %arg2: memref<256x128xbf16, #tpu.memory_space<vmem>>, %arg3: memref<1x128xf32, #tpu.memory_space<vmem>>, %arg4: memref<128x256xbf16, #tpu.memory_space<vmem>>, %arg5: memref<1x256xf32, #tpu.memory_space<vmem>>, %arg6: memref<256x64xbf16, #tpu.memory_space<vmem>>, %arg7: memref<1x64xf32, #tpu.memory_space<vmem>>, %arg8: memref<64x128xbf16, #tpu.memory_space<vmem>>, %arg9: memref<1x128xf32, #tpu.memory_space<vmem>>, %arg10: memref<8x128xbf16, #tpu.memory_space<vmem>>) attributes {dimension_semantics = [#tpu.dimension_semantics<parallel>], iteration_bounds = array<i64: 1>, scalar_prefetch = 0 : i64, scratch_operands = 0 : i64, tpu.core_type = #tpu.core_type<tc>, window_params = [{transform_indices = @transform_0, window_bounds = array<i64: 8, 256>}, {pipeline_mode = #tpu.pipeline_mode<synchronous>, transform_indices = @transform_1, window_bounds = array<i64: 256, 128>}, {pipeline_mode = #tpu.pipeline_mode<synchronous>, transform_indices = @transform_2, window_bounds = array<i64: 1, 128>}, {pipeline_mode = #tpu.pipeline_mode<synchronous>, transform_indices = @transform_3, window_bounds = array<i64: 128, 256>}, {pipeline_mode = #tpu.pipeline_mode<synchronous>, transform_indices = @transform_4, window_bounds = array<i64: 1, 256>}, {pipeline_mode = #tpu.pipeline_mode<synchronous>, transform_indices = @transform_5, window_bounds = array<i64: 256, 64>}, {pipeline_mode = #tpu.pipeline_mode<synchronous>, transform_indices = @transform_6, window_bounds = array<i64: 1, 64>}, {pipeline_mode = #tpu.pipeline_mode<synchronous>, transform_indices = @transform_7, window_bounds = array<i64: 64, 128>}, {pipeline_mode = #tpu.pipeline_mode<synchronous>, transform_indices = @transform_8, window_bounds = array<i64: 1, 128>}, {transform_indices = @transform_9, window_bounds = array<i64: 8, 128>}]} {
    %c0 = arith.constant 0 : index
    %c0_0 = arith.constant 0 : index
    %0 = vector.load %arg1[%c0, %c0_0] : memref<8x256xf32, #tpu.memory_space<vmem>>, vector<8x256xf32>
    %1 = arith.truncf %0 : vector<8x256xf32> to vector<8x256xbf16>
    %c0_1 = arith.constant 0 : index
    %c0_2 = arith.constant 0 : index
    %2 = vector.load %arg2[%c0_1, %c0_2] : memref<256x128xbf16, #tpu.memory_space<vmem>>, vector<256x128xbf16>
    %cst = arith.constant dense<0.000000e+00> : vector<8x128xf32>
    %3 = tpu.matmul %1, %2, %cst {dimension_numbers = #tpu.dot_dimension_numbers<[1], [0], [0], [1], [0, 0, 1, 1], [], []>} : vector<8x256xbf16>, vector<256x128xbf16>, vector<8x128xf32> -> vector<8x128xf32>
    %c0_3 = arith.constant 0 : index
    %c0_4 = arith.constant 0 : index
    %4 = vector.load %arg3[%c0_3, %c0_4] : memref<1x128xf32, #tpu.memory_space<vmem>>, vector<1x128xf32>
    %5 = vector.broadcast %4 : vector<1x128xf32> to vector<8x128xf32>
    %6 = arith.addf %3, %5 : vector<8x128xf32>
    %cst_5 = arith.constant 0.000000e+00 : f32
    %7 = vector.broadcast %cst_5 : f32 to vector<8x128xf32>
    %8 = arith.maximumf %6, %7 : vector<8x128xf32>
    %9 = arith.truncf %8 : vector<8x128xf32> to vector<8x128xbf16>
    %c0_6 = arith.constant 0 : index
    %c0_7 = arith.constant 0 : index
    %10 = vector.load %arg4[%c0_6, %c0_7] : memref<128x256xbf16, #tpu.memory_space<vmem>>, vector<128x256xbf16>
    %cst_8 = arith.constant dense<0.000000e+00> : vector<8x256xf32>
    %11 = tpu.matmul %9, %10, %cst_8 {dimension_numbers = #tpu.dot_dimension_numbers<[1], [0], [0], [1], [0, 0, 1, 1], [], []>} : vector<8x128xbf16>, vector<128x256xbf16>, vector<8x256xf32> -> vector<8x256xf32>
    %c0_9 = arith.constant 0 : index
    %c0_10 = arith.constant 0 : index
    %12 = vector.load %arg5[%c0_9, %c0_10] : memref<1x256xf32, #tpu.memory_space<vmem>>, vector<1x256xf32>
    %13 = vector.broadcast %12 : vector<1x256xf32> to vector<8x256xf32>
    %14 = arith.addf %11, %13 : vector<8x256xf32>
    %cst_11 = arith.constant 0.000000e+00 : f32
    %15 = vector.broadcast %cst_11 : f32 to vector<8x256xf32>
    %16 = arith.maximumf %14, %15 : vector<8x256xf32>
    %17 = arith.truncf %16 : vector<8x256xf32> to vector<8x256xbf16>
    %c0_12 = arith.constant 0 : index
    %c0_13 = arith.constant 0 : index
    %18 = vector.load %arg6[%c0_12, %c0_13] : memref<256x64xbf16, #tpu.memory_space<vmem>>, vector<256x64xbf16>
    %cst_14 = arith.constant dense<0.000000e+00> : vector<8x64xf32>
    %19 = tpu.matmul %17, %18, %cst_14 {dimension_numbers = #tpu.dot_dimension_numbers<[1], [0], [0], [1], [0, 0, 1, 1], [], []>} : vector<8x256xbf16>, vector<256x64xbf16>, vector<8x64xf32> -> vector<8x64xf32>
    %c0_15 = arith.constant 0 : index
    %c0_16 = arith.constant 0 : index
    %20 = vector.load %arg7[%c0_15, %c0_16] : memref<1x64xf32, #tpu.memory_space<vmem>>, vector<1x64xf32>
    %21 = vector.broadcast %20 : vector<1x64xf32> to vector<8x64xf32>
    %22 = arith.addf %19, %21 : vector<8x64xf32>
    %cst_17 = arith.constant 0.000000e+00 : f32
    %23 = vector.broadcast %cst_17 : f32 to vector<8x64xf32>
    %24 = arith.maximumf %22, %23 : vector<8x64xf32>
    %25 = arith.truncf %24 : vector<8x64xf32> to vector<8x64xbf16>
    %c0_18 = arith.constant 0 : index
    %c0_19 = arith.constant 0 : index
    %26 = vector.load %arg8[%c0_18, %c0_19] : memref<64x128xbf16, #tpu.memory_space<vmem>>, vector<64x128xbf16>
    %cst_20 = arith.constant dense<0.000000e+00> : vector<8x128xf32>
    %27 = tpu.matmul %25, %26, %cst_20 {dimension_numbers = #tpu.dot_dimension_numbers<[1], [0], [0], [1], [0, 0, 1, 1], [], []>} : vector<8x64xbf16>, vector<64x128xbf16>, vector<8x128xf32> -> vector<8x128xf32>
    %c0_21 = arith.constant 0 : index
    %c0_22 = arith.constant 0 : index
    %28 = vector.load %arg9[%c0_21, %c0_22] : memref<1x128xf32, #tpu.memory_space<vmem>>, vector<1x128xf32>
    %29 = vector.broadcast %28 : vector<1x128xf32> to vector<8x128xf32>
    %30 = arith.addf %27, %29 : vector<8x128xf32>
    %31 = arith.truncf %30 : vector<8x128xf32> to vector<8x128xbf16>
    %c0_23 = arith.constant 0 : index
    %c0_24 = arith.constant 0 : index
    %32 = vector.load %arg10[%c0_23, %c0_24] : memref<8x128xbf16, #tpu.memory_space<vmem>>, vector<8x128xbf16>
    tpu.vector_store %arg10[%c0_23, %c0_24], %31 {strides = array<i32>} : memref<8x128xbf16, #tpu.memory_space<vmem>>, vector<8x128xbf16>,
    return
  }
  func.func @transform_0(%arg0: i32) -> (i32, i32) {
    %c0_i32 = arith.constant 0 : i32
    %c0_i32_0 = arith.constant 0 : i32
    return %arg0, %c0_i32 : i32, i32
  }
  func.func @transform_1(%arg0: i32) -> (i32, i32) {
    %c0_i32 = arith.constant 0 : i32
    %c0_i32_0 = arith.constant 0 : i32
    %c0_i32_1 = arith.constant 0 : i32
    return %c0_i32, %c0_i32_0 : i32, i32
  }
  func.func @transform_2(%arg0: i32) -> (i32, i32) {
    %c0_i32 = arith.constant 0 : i32
    %c0_i32_0 = arith.constant 0 : i32
    %c0_i32_1 = arith.constant 0 : i32
    return %c0_i32, %c0_i32_0 : i32, i32
  }
  func.func @transform_3(%arg0: i32) -> (i32, i32) {
    %c0_i32 = arith.constant 0 : i32
    %c0_i32_0 = arith.constant 0 : i32
    %c0_i32_1 = arith.constant 0 : i32
    return %c0_i32, %c0_i32_0 : i32, i32
  }
  func.func @transform_4(%arg0: i32) -> (i32, i32) {
    %c0_i32 = arith.constant 0 : i32
    %c0_i32_0 = arith.constant 0 : i32
    %c0_i32_1 = arith.constant 0 : i32
    return %c0_i32, %c0_i32_0 : i32, i32
  }
  func.func @transform_5(%arg0: i32) -> (i32, i32) {
    %c0_i32 = arith.constant 0 : i32
    %c0_i32_0 = arith.constant 0 : i32
    %c0_i32_1 = arith.constant 0 : i32
    return %c0_i32, %c0_i32_0 : i32, i32
  }
  func.func @transform_6(%arg0: i32) -> (i32, i32) {
    %c0_i32 = arith.constant 0 : i32
    %c0_i32_0 = arith.constant 0 : i32
    %c0_i32_1 = arith.constant 0 : i32
    return %c0_i32, %c0_i32_0 : i32, i32
  }
  func.func @transform_7(%arg0: i32) -> (i32, i32) {
    %c0_i32 = arith.constant 0 : i32
    %c0_i32_0 = arith.constant 0 : i32
    %c0_i32_1 = arith.constant 0 : i32
    return %c0_i32, %c0_i32_0 : i32, i32
  }
  func.func @transform_8(%arg0: i32) -> (i32, i32) {
    %c0_i32 = arith.constant 0 : i32
    %c0_i32_0 = arith.constant 0 : i32
    %c0_i32_1 = arith.constant 0 : i32
    return %c0_i32, %c0_i32_0 : i32, i32
  }
  func.func @transform_9(%arg0: i32) -> (i32, i32) {
    %c0_i32 = arith.constant 0 : i32
    %c0_i32_0 = arith.constant 0 : i32
    return %arg0, %c0_i32 : i32, i32
  }
}

</mosaic_0001>

<bundles_post_ra>
// kernel: tpu_custom_call.1
= control target key start
LH: loop header
LB: loop body
LE: loop exit
PB: predicated region body
PF: predicated region fallthrough
CT: control target
= control target key end

     0   :  { %14 = vsyncpa [#allocation3], 0  ;;  %s1084_s0 = inlined_call_operand.vmem [shape: f32[8,256], index: 0, kind: input, shape index: {}]   ;;  %s1085_s1 = inlined_call_operand.vmem [shape: bf16[256,128], index: 1, kind: input, shape index: {}]   ;;  %s1086_s2 = inlined_call_operand.vmem [shape: f32[1,128], index: 2, kind: input, shape index: {}]   ;;  %s1087_s3 = inlined_call_operand.hbm [shape: bf16[128,256], index: 3, kind: input, shape index: {}]   ;;  %s1088_s4 = inlined_call_operand.vmem [shape: f32[1,256], index: 4, kind: input, shape index: {}]   ;;  %s1089_s5 = inlined_call_operand.vmem [shape: bf16[256,64], index: 5, kind: input, shape index: {}]   ;;  %s1090_s6 = inlined_call_operand.vmem [shape: f32[1,64], index: 6, kind: input, shape index: {}]   ;;  %s1091_s7 = inlined_call_operand.vmem [shape: bf16[64,128], index: 7, kind: input, shape index: {}]   ;;  %s1092_s8 = inlined_call_operand.vmem [shape: f32[1,128], index: 8, kind: input, shape index: {}]   ;;  %s1093_s9 = inlined_call_operand.hbm [shape: bf16[8,128], index: 9, kind: output, shape index: {}]  }
   0x1   :  { %15 = vsyncpa [#allocation4], 0  ;;  %s26_s11 = sshll.u32 %s1087_s3, 4  ;;  %s898_s12 = smov [#allocation2]   ;;  %s27_s11 = int_to_ptr.hbm [resolvable:$true] %s26_s11 }
   0x2   :  { %s28_s13 = sshll.u32 %s898_s12, 4  ;;  %s899_s14 = smov 128   ;;  %s29_s13 = int_to_ptr.vmem [resolvable:$true] %s28_s13 }
   0x3   :  { %s900_s15 = smov 8  }
   0x4   :  { %34 = dma.hbm_to_vmem [thread:$0]  %s27_s11, 2048, %s29_s13, [#allocation3], %s899_s14, %s899_s14, %s900_s15  }
   0x5   :  { %894 = dma.done.wait [#allocation3], 2048  }
   0x6   :  { %895 = vsyncadd [#allocation3], 4294965248  ;;  %v794_v0 = vld [vmem:[%s1085_s1 + $0x38] sm:$0xff]  ;;  %v793_v2 = vld [vmem:[%s1085_s1 + $0x30] sm:$0xff]  ;;  %vm542_vm0 = vcmask 523264  }
   0x7   :  { %v802_v1 = vld [vmem:[%s1085_s1 + $0x78] sm:$0xff]  ;;  %186 = vmatpush.bf16.msra.mxu0 %v794_v0  ;;  %v801_v3 = vld [vmem:[%s1085_s1 + $0x70] sm:$0xff]  ;;  %v792_v4 = vld [vmem:[%s1085_s1 + $0x28] sm:$0xff] }
   0x8   :  { %199 = vmatpush.bf16.msra.mxu1 %v802_v1  ;;  %v800_v5 = vld [vmem:[%s1085_s1 + $0x68] sm:$0xff]  ;;  %v700_v6 = vld [vmem:[#allocation2 + $0x70] sm:$0xf]  ;;  %v818_v7 = vld [vmem:[#allocation2 + $0x74] sm:$0xf0] }
   0x9   :  { %v817_v8 = vld [vmem:[#allocation2 + $0x74] sm:$0xf]  ;;  %v701_v9 = vor.u32 %v818_v7, %v700_v6  ;;  %v702_v10 = vld [vmem:[#allocation2 + $0x78] sm:$0xf0]  ;;  %v692_v11 = vld [vmem:[#allocation2 + $0x60] sm:$0xf] }
   0xa   :  { %v816_v12 = vld [vmem:[#allocation2 + $0x64] sm:$0xf0]  ;;  %v705_v13 = vor.u32 %v817_v8, %v702_v10  ;;  %v815_v14 = vld [vmem:[#allocation2 + $0x64] sm:$0xf]  ;;  %v694_v15 = vld [vmem:[#allocation2 + $0x68] sm:$0xf0] }
   0xb   :  { %187 = vmatpush.bf16.msra.mxu0 %v793_v2  ;;  %v791_v16 = vld [vmem:[%s1085_s1 + $0x20] sm:$0xff]  ;;  %316 = vmatpush.bf16.msra.mxu2 %v701_v9  ;;  %v693_v17 = vor.u32 %v816_v12, %v692_v11  ;;  %v684_v19 = vld [vmem:[#allocation2 + $0x50] sm:$0xf]  ;;  %v814_v20 = vld [vmem:[#allocation2 + $0x54] sm:$0xf0]  ;;  %v697_v21 = vor.u32 %v815_v14, %v694_v15 }
   0xc   :  { %200 = vmatpush.bf16.msra.mxu1 %v801_v3  ;;  %v799_v18 = vld [vmem:[%s1085_s1 + $0x60] sm:$0xff]  ;;  %329 = vmatpush.bf16.msra.mxu3 %v705_v13  ;;  %v813_v22 = vld [vmem:[#allocation2 + $0x54] sm:$0xf]  ;;  %v686_v23 = vld [vmem:[#allocation2 + $0x58] sm:$0xf0]  ;;  %v685_v26 = vor.u32 %v814_v20, %v684_v19 }
   0xd   :  { %v790_v24 = vld [vmem:[%s1085_s1 + $0x18] sm:$0xff]  ;;  %v676_v27 = vld [vmem:[#allocation2 + $0x40] sm:$0xf]  ;;  %v812_v28 = vld [vmem:[#allocation2 + $0x44] sm:$0xf0]  ;;  %v689_v29 = vor.u32 %v813_v22, %v686_v23 }
   0xe   :  { %v798_v25 = vld [vmem:[%s1085_s1 + $0x58] sm:$0xff]  ;;  %v811_v30 = vld [vmem:[#allocation2 + $0x44] sm:$0xf]  ;;  %v678_v31 = vld [vmem:[#allocation2 + $0x48] sm:$0xf0]  ;;  %v677_v33 = vor.u32 %v812_v28, %v676_v27 }
   0xf   :  { %188 = vmatpush.bf16.msra.mxu0 %v792_v4  ;;  %317 = vmatpush.bf16.msra.mxu2 %v693_v17  ;;  %v789_v32 = vld [vmem:[%s1085_s1 + $0x10] sm:$0xff]  ;;  %v810_v36 = vld [vmem:[#allocation2 + $0x34] sm:$0xf0]  ;;  %v681_v37 = vor.u32 %v811_v30, %v678_v31  ;;  %v670_v39 = vld [vmem:[#allocation2 + $0x38] sm:$0xf0] }
  0x10   :  { %201 = vmatpush.bf16.msra.mxu1 %v800_v5  ;;  %330 = vmatpush.bf16.msra.mxu3 %v697_v21  ;;  %v797_v34 = vld [vmem:[%s1085_s1 + $0x50] sm:$0xff]  ;;  %v788_v40 = vld [vmem:[%s1085_s1 + $0x8] sm:$0xff]  ;;  %v660_v43 = vld [vmem:[#allocation2 + $0x20] sm:$0xf] }
  0x11   :  { %v668_v35 = vld [vmem:[#allocation2 + $0x30] sm:$0xf]  ;;  %v809_v38 = vld [vmem:[#allocation2 + $0x34] sm:$0xf]  ;;  %v796_v42 = vld [vmem:[%s1085_s1 + $0x48] sm:$0xff] }
  0x12   :  { %v669_v41 = vor.u32 %v810_v36, %v668_v35  ;;  %v808_v44 = vld [vmem:[#allocation2 + $0x24] sm:$0xf0]  ;;  %v673_v45 = vor.u32 %v809_v38, %v670_v39  ;;  %v807_v46 = vld [vmem:[#allocation2 + $0x24] sm:$0xf]  ;;  %v662_v47 = vld [vmem:[#allocation2 + $0x28] sm:$0xf0] }
  0x13   :  { %189 = vmatpush.bf16.msra.mxu0 %v791_v16  ;;  %318 = vmatpush.bf16.msra.mxu2 %v685_v26  ;;  %v787_v48 = vld [vmem:[%s1085_s1] sm:$0xff]  ;;  %v661_v49 = vor.u32 %v808_v44, %v660_v43  ;;  %v51_v52 = vld [vmem:[%s1084_s0 + $0x8] sm:$0xff]  ;;  %v665_v53 = vor.u32 %v807_v46, %v662_v47  ;;  %v652_v56 = vld [vmem:[#allocation2 + $0x10] sm:$0xf] }
  0x14   :  { %202 = vmatpush.bf16.msra.mxu1 %v799_v18  ;;  %331 = vmatpush.bf16.msra.mxu3 %v689_v29  ;;  %v795_v50 = vld [vmem:[%s1085_s1 + $0x40] sm:$0xff]  ;;  %v53_v55 = vpack.c.bf16 %v51_v52, %v51_v52  ;;  %v806_v57 = vld [vmem:[#allocation2 + $0x14] sm:$0xf0]  ;;  %v805_v58 = vld [vmem:[#allocation2 + $0x14] sm:$0xf] }
  0x15   :  { %v50_v51 = vld [vmem:[%s1084_s0] sm:$0xff]  ;;  %v653_v59 = vor.u32 %v806_v57, %v652_v56  ;;  %v654_v60 = vld [vmem:[#allocation2 + $0x18] sm:$0xf0]  ;;  %v804_v63 = vld [vmem:[#allocation2 + $0x4] sm:$0xf0] }
  0x16   :  { %v52_v54 = vpack.c.bf16 %v50_v51, %v50_v51  ;;  %v657_v61 = vor.u32 %v805_v58, %v654_v60  ;;  %v644_v62 = vld [vmem:[#allocation2] sm:$0xf]  ;;  %v803_v0 = vld [vmem:[#allocation2 + $0x4] sm:$0xf]  ;;  %v646_v2 = vld [vmem:[#allocation2 + $0x8] sm:$0xf0] }
  0x17   :  { %190 = vmatpush.bf16.msra.mxu0 %v790_v24  ;;  %319 = vmatpush.bf16.msra.mxu2 %v677_v33  ;;  %v645_v1 = vor.u32 %v804_v63, %v644_v62  ;;  %v649_v3 = vor.u32 %v803_v0, %v646_v2  ;;  %v826_v4 = vld [vmem:[%s1089_s5 + $0x38] sm:$0xff]  ;;  %v825_v6 = vld [vmem:[%s1089_s5 + $0x30] sm:$0xff]  ;;  %v824_v8 = vld [vmem:[%s1089_s5 + $0x28] sm:$0xff] }
  0x18   :  { %203 = vmatpush.bf16.msra.mxu1 %v798_v25  ;;  %332 = vmatpush.bf16.msra.mxu3 %v681_v37  ;;  %v834_v5 = vld [vmem:[%s1089_s5 + $0x78] sm:$0xff]  ;;  %v833_v7 = vld [vmem:[%s1089_s5 + $0x70] sm:$0xff]  ;;  %v832_v9 = vld [vmem:[%s1089_s5 + $0x68] sm:$0xff] }
  0x19   :  { %v823_v10 = vld [vmem:[%s1089_s5 + $0x20] sm:$0xff]  ;;  %v822_v12 = vld [vmem:[%s1089_s5 + $0x18] sm:$0xff]  ;;  %v821_v14 = vld [vmem:[%s1089_s5 + $0x10] sm:$0xff] }
  0x1a   :  { %v831_v11 = vld [vmem:[%s1089_s5 + $0x60] sm:$0xff]  ;;  %v830_v13 = vld [vmem:[%s1089_s5 + $0x58] sm:$0xff]  ;;  %v829_v15 = vld [vmem:[%s1089_s5 + $0x50] sm:$0xff] }
  0x1b   :  { %191 = vmatpush.bf16.msra.mxu0 %v789_v32  ;;  %320 = vmatpush.bf16.msra.mxu2 %v669_v41  ;;  %v843_v16 = vld [vmem:[%s1086_s2] ss:$0 sm:$0xff]  ;;  %v820_v25 = vld [vmem:[%s1089_s5 + $0x8] sm:$0xff]  ;;  %v838_v29 = vld [vmem:[%s1091_s7 + $0x18] sm:$0xff] }
  0x1c   :  { %204 = vmatpush.bf16.msra.mxu1 %v797_v34  ;;  %333 = vmatpush.bf16.msra.mxu3 %v673_v45  ;;  %v828_v26 = vld [vmem:[%s1089_s5 + $0x48] sm:$0xff]  ;;  %v819_v27 = vld [vmem:[%s1089_s5] sm:$0xff]  ;;  %v837_v30 = vld [vmem:[%s1091_s7 + $0x10] sm:$0xff] }
  0x1d   :  { %v827_v28 = vld [vmem:[%s1089_s5 + $0x40] sm:$0xff]  ;;  %v836_v44 = vld [vmem:[%s1091_s7 + $0x8] sm:$0xff] }
  0x1e   :  { %v230_v31 = vld [vmem:[%s1088_s4] sm:$0x3] }
  0x1f   :  { %192 = vmatpush.bf16.msra.mxu0 %v788_v40  ;;  %321 = vmatpush.bf16.msra.mxu2 %v661_v49  ;;  %v232_v32 = vperm.slane %v230_v31, 0  ;;  %v233_v33 = vperm.slane %v230_v31, 1  ;;  %v835_v45 = vld [vmem:[%s1091_s7] sm:$0xff]  ;;  %s901_s7 = smov [#allocation5]  }
  0x20   :  { %205 = vmatpush.bf16.msra.mxu1 %v796_v42  ;;  %334 = vmatpush.bf16.msra.mxu3 %v665_v53  ;;  %v844_v46 = vld [vmem:[%s1090_s6] ss:$0 sm:$0xff]  ;;  %s566_s26 = sshll.u32 %s901_s7, 4  ;;  %s568_s6 = sshll.u32 %s1093_s9, 4  ;;  %s567_s26 = int_to_ptr.vmem [resolvable:$true] %s566_s26  ;;  %s569_s6 = int_to_ptr.hbm [resolvable:$true] %s568_s6 }
  0x23   :  { %193 = vmatpush.bf16.msra.mxu0 %v787_v48  ;;  %322 = vmatpush.bf16.msra.mxu2 %v653_v59 }
  0x24   :  { %206 = vmatpush.bf16.msra.mxu1 %v795_v50  ;;  %335 = vmatpush.bf16.msra.mxu3 %v657_v61 }
  0x26   :  { %194 = vmatmul.bf16.vlgmr.msra.gmra.mxu0 %v52_v54 }
  0x27   :  { %207 = vmatmul.bf16.vlgmr.msra.gmra.mxu1 %v53_v55  ;;  %323 = vmatpush.bf16.msra.mxu2 %v645_v1  ;;  %v845_v55 = vld [vmem:[%s1092_s8] ss:$0 sm:$0xff] }
  0x28   :  { %336 = vmatpush.bf16.msra.mxu3 %v649_v3  ;;  %478 = vmatpush.bf16.msrb.mxu0 %v826_v4 }
  0x29   :  { %491 = vmatpush.bf16.msrb.mxu1 %v834_v5 }
  0x2b   :  { %550 = vmatpush.bf16.msrb.mxu2 %v838_v29 }
  0x2c   :  { %479 = vmatpush.bf16.msrb.mxu0 %v825_v6 }
  0x2d   :  { %492 = vmatpush.bf16.msrb.mxu1 %v833_v7 }
  0x2f   :  { %551 = vmatpush.bf16.msrb.mxu2 %v837_v30 }
  0x30   :  { %480 = vmatpush.bf16.msrb.mxu0 %v824_v8 }
  0x31   :  { %493 = vmatpush.bf16.msrb.mxu1 %v832_v9 }
  0x33   :  { %552 = vmatpush.bf16.msrb.mxu2 %v836_v44 }
  0x34   :  { %481 = vmatpush.bf16.msrb.mxu0 %v823_v10 }
  0x35   :  { %494 = vmatpush.bf16.msrb.mxu1 %v831_v11 }
  0x37   :  { %553 = vmatpush.bf16.msrb.mxu2 %v835_v45 }
  0x38   :  { %482 = vmatpush.bf16.msrb.mxu0 %v822_v12 }
  0x39   :  { %495 = vmatpush.bf16.msrb.mxu1 %v830_v13 }
  0x3c   :  { %483 = vmatpush.bf16.msrb.mxu0 %v821_v14 }
  0x3d   :  { %496 = vmatpush.bf16.msrb.mxu1 %v829_v15 }
  0x40   :  { %484 = vmatpush.bf16.msrb.mxu0 %v820_v25 }
  0x41   :  { %497 = vmatpush.bf16.msrb.mxu1 %v828_v26 }
  0x44   :  { %485 = vmatpush.bf16.msrb.mxu0 %v819_v27 }
  0x45   :  { %498 = vmatpush.bf16.msrb.mxu1 %v827_v28 }
  0xa3   :  { %v195_v17 = vpop.f32.mrf.mxu0 }
  0xa4   :  { %v208_v18 = vpop.f32.mrf.mxu1  ;;  %v196_v19 = vadd.f32 %v843_v16, %v195_v17 }
  0xa6   :  { %v209_v20 = vadd.f32 %v208_v18, %v196_v19 }
  0xa8   :  { %v212_v21 = vmax.f32 %v209_v20, 0.0 }
  0xaa   :  { %v213_v22 = vpack.c.bf16 %v212_v21, %v212_v21 }
  0xab   :  { %v197_v23 = vpop.f32.mrf.mxu0 }
  0xac   :  { %v210_v24 = vpop.f32.mrf.mxu1  ;;  %324 = vmatmul.bf16.vlgmr.msra.gmra.mxu2 %v213_v22  ;;  %337 = vmatmul.bf16.vlgmr.msra.gmra.mxu3 %v213_v22 }
 0x12f   :  { %v325_v34 = vpop.f32.mrf.mxu2  ;;  %v338_v35 = vpop.f32.mrf.mxu3 }
 0x130   :  { %v326_v36 = vadd.f32 %v325_v34, %v232_v32  ;;  %v339_v37 = vadd.f32 %v338_v35, %v233_v33 }
 0x132   :  { %v342_v38 = vmax.f32 %v326_v36, 0.0  ;;  %v343_v39 = vmax.f32 %v339_v37, 0.0 }
 0x134   :  { %v344_v40 = vpack.c.bf16 %v342_v38, %v342_v38  ;;  %v345_v41 = vpack.c.bf16 %v343_v39, %v343_v39 }
 0x136   :  { %486 = vmatmul.bf16.vlgmr.msrb.gmra.mxu0 %v344_v40  ;;  %499 = vmatmul.bf16.vlgmr.msrb.gmra.mxu1 %v345_v41 }
 0x137   :  { %v327_v42 = vpop.f32.mrf.mxu2  ;;  %v340_v43 = vpop.f32.mrf.mxu3 }
 0x1b3   :  { %v487_v47 = vpop.f32.mrf.mxu0  ;;  %v500_v48 = vpop.f32.mrf.mxu1 }
 0x1b4   :  { %v488_v49 = vadd.f32 %v844_v46, %v487_v47 }
 0x1b6   :  { %v501_v50 = vadd.f32 %v500_v48, %v488_v49 }
 0x1b8   :  { %v504_v51 = vmax.f32 %v501_v50, 0.0 }
 0x1ba   :  { %v505_v52 = vpack.c.bf16 %v504_v51, %v504_v51 }
 0x1bb   :  { %v489_v53 = vpop.f32.mrf.mxu0  ;;  %v502_v54 = vpop.f32.mrf.mxu1 }
 0x1bc   :  { %786 = vmatmul.msk.bf16.vlgmr.msrb.gmra.mxu2 %vm542_vm0, %v505_v52 }
 0x23f   :  { %v555_v56 = vpop.f32.mrf.mxu2 }
 0x240   :  { %v556_v57 = vadd.f32 %v845_v55, %v555_v56 }
 0x242   :  { %v559_v58 = vpack.c.bf16 %v556_v57, %v556_v57 }
 0x244   :  { %560 = vst [vmem:[#allocation5] sm:$0xf] %v559_v58 }
 0x245   :  { %571 = dma.vmem_to_hbm [thread:$0]  %s567_s26, 64, %s569_s6, [#allocation4]  }
 0x247   :  { %v557_v59 = vpop.f32.mrf.mxu2 }
 0x248   :  { %896 = dma.done.wait [#allocation4], 64  }
 0x249   :  { %897 = vsyncadd [#allocation4], 4294967232 }
 0x24a   :  { %576 = vsyncpa [#allocation3], 1 }
 0x24b   :  { %577 = vsyncpa [#allocation4], 1 }

// kernel: tpu_custom_call.1
= control target key start
LH: loop header
LB: loop body
LE: loop exit
PB: predicated region body
PF: predicated region fallthrough
CT: control target
= control target key end

     0   :  { %14 = vsyncpa [#allocation3], 0  ;;  %s1084_s0 = inlined_call_operand.vmem [shape: f32[8,256], index: 0, kind: input, shape index: {}]   ;;  %s1085_s1 = inlined_call_operand.vmem [shape: bf16[256,128], index: 1, kind: input, shape index: {}]   ;;  %s1086_s2 = inlined_call_operand.vmem [shape: f32[1,128], index: 2, kind: input, shape index: {}]   ;;  %s1087_s3 = inlined_call_operand.hbm [shape: bf16[128,256], index: 3, kind: input, shape index: {}]   ;;  %s1088_s4 = inlined_call_operand.vmem [shape: f32[1,256], index: 4, kind: input, shape index: {}]   ;;  %s1089_s5 = inlined_call_operand.vmem [shape: bf16[256,64], index: 5, kind: input, shape index: {}]   ;;  %s1090_s6 = inlined_call_operand.vmem [shape: f32[1,64], index: 6, kind: input, shape index: {}]   ;;  %s1091_s7 = inlined_call_operand.vmem [shape: bf16[64,128], index: 7, kind: input, shape index: {}]   ;;  %s1092_s8 = inlined_call_operand.vmem [shape: f32[1,128], index: 8, kind: input, shape index: {}]   ;;  %s1093_s9 = inlined_call_operand.hbm [shape: bf16[8,128], index: 9, kind: output, shape index: {}]  }
   0x1   :  { %15 = vsyncpa [#allocation4], 0  ;;  %s26_s11 = sshll.u32 %s1087_s3, 4  ;;  %s898_s12 = smov [#allocation2]   ;;  %s27_s11 = int_to_ptr.hbm [resolvable:$true] %s26_s11 }
   0x2   :  { %s28_s13 = sshll.u32 %s898_s12, 4  ;;  %s899_s14 = smov 128   ;;  %s29_s13 = int_to_ptr.vmem [resolvable:$true] %s28_s13 }
   0x3   :  { %s900_s15 = smov 8  }
   0x4   :  { %34 = dma.hbm_to_vmem [thread:$0]  %s27_s11, 2048, %s29_s13, [#allocation3], %s899_s14, %s899_s14, %s900_s15  }
   0x5   :  { %894 = dma.done.wait [#allocation3], 2048  }
   0x6   :  { %895 = vsyncadd [#allocation3], 4294965248  ;;  %v794_v0 = vld [vmem:[%s1085_s1 + $0x38] sm:$0xff]  ;;  %v793_v2 = vld [vmem:[%s1085_s1 + $0x30] sm:$0xff]  ;;  %vm542_vm0 = vcmask 523264  }
   0x7   :  { %v802_v1 = vld [vmem:[%s1085_s1 + $0x78] sm:$0xff]  ;;  %186 = vmatpush.bf16.msra.mxu0 %v794_v0  ;;  %v801_v3 = vld [vmem:[%s1085_s1 + $0x70] sm:$0xff]  ;;  %v792_v4 = vld [vmem:[%s1085_s1 + $0x28] sm:$0xff] }
   0x8   :  { %199 = vmatpush.bf16.msra.mxu1 %v802_v1  ;;  %v800_v5 = vld [vmem:[%s1085_s1 + $0x68] sm:$0xff]  ;;  %v700_v6 = vld [vmem:[#allocation2 + $0x70] sm:$0xf]  ;;  %v818_v7 = vld [vmem:[#allocation2 + $0x74] sm:$0xf0] }
   0x9   :  { %v817_v8 = vld [vmem:[#allocation2 + $0x74] sm:$0xf]  ;;  %v701_v9 = vor.u32 %v818_v7, %v700_v6  ;;  %v702_v10 = vld [vmem:[#allocation2 + $0x78] sm:$0xf0]  ;;  %v692_v11 = vld [vmem:[#allocation2 + $0x60] sm:$0xf] }
   0xa   :  { %v816_v12 = vld [vmem:[#allocation2 + $0x64] sm:$0xf0]  ;;  %v705_v13 = vor.u32 %v817_v8, %v702_v10  ;;  %v815_v14 = vld [vmem:[#allocation2 + $0x64] sm:$0xf]  ;;  %v694_v15 = vld [vmem:[#allocation2 + $0x68] sm:$0xf0] }
   0xb   :  { %187 = vmatpush.bf16.msra.mxu0 %v793_v2  ;;  %v791_v16 = vld [vmem:[%s1085_s1 + $0x20] sm:$0xff]  ;;  %316 = vmatpush.bf16.msra.mxu2 %v701_v9  ;;  %v693_v17 = vor.u32 %v816_v12, %v692_v11  ;;  %v684_v19 = vld [vmem:[#allocation2 + $0x50] sm:$0xf]  ;;  %v814_v20 = vld [vmem:[#allocation2 + $0x54] sm:$0xf0]  ;;  %v697_v21 = vor.u32 %v815_v14, %v694_v15 }
   0xc   :  { %200 = vmatpush.bf16.msra.mxu1 %v801_v3  ;;  %v799_v18 = vld [vmem:[%s1085_s1 + $0x60] sm:$0xff]  ;;  %329 = vmatpush.bf16.msra.mxu3 %v705_v13  ;;  %v813_v22 = vld [vmem:[#allocation2 + $0x54] sm:$0xf]  ;;  %v686_v23 = vld [vmem:[#allocation2 + $0x58] sm:$0xf0]  ;;  %v685_v26 = vor.u32 %v814_v20, %v684_v19 }
   0xd   :  { %v790_v24 = vld [vmem:[%s1085_s1 + $0x18] sm:$0xff]  ;;  %v676_v27 = vld [vmem:[#allocation2 + $0x40] sm:$0xf]  ;;  %v812_v28 = vld [vmem:[#allocation2 + $0x44] sm:$0xf0]  ;;  %v689_v29 = vor.u32 %v813_v22, %v686_v23 }
   0xe   :  { %v798_v25 = vld [vmem:[%s1085_s1 + $0x58] sm:$0xff]  ;;  %v811_v30 = vld [vmem:[#allocation2 + $0x44] sm:$0xf]  ;;  %v678_v31 = vld [vmem:[#allocation2 + $0x48] sm:$0xf0]  ;;  %v677_v33 = vor.u32 %v812_v28, %v676_v27 }
   0xf   :  { %188 = vmatpush.bf16.msra.mxu0 %v792_v4  ;;  %317 = vmatpush.bf16.msra.mxu2 %v693_v17  ;;  %v789_v32 = vld [vmem:[%s1085_s1 + $0x10] sm:$0xff]  ;;  %v810_v36 = vld [vmem:[#allocation2 + $0x34] sm:$0xf0]  ;;  %v681_v37 = vor.u32 %v811_v30, %v678_v31  ;;  %v670_v39 = vld [vmem:[#allocation2 + $0x38] sm:$0xf0] }
  0x10   :  { %201 = vmatpush.bf16.msra.mxu1 %v800_v5  ;;  %330 = vmatpush.bf16.msra.mxu3 %v697_v21  ;;  %v797_v34 = vld [vmem:[%s1085_s1 + $0x50] sm:$0xff]  ;;  %v788_v40 = vld [vmem:[%s1085_s1 + $0x8] sm:$0xff]  ;;  %v660_v43 = vld [vmem:[#allocation2 + $0x20] sm:$0xf] }
  0x11   :  { %v668_v35 = vld [vmem:[#allocation2 + $0x30] sm:$0xf]  ;;  %v809_v38 = vld [vmem:[#allocation2 + $0x34] sm:$0xf]  ;;  %v796_v42 = vld [vmem:[%s1085_s1 + $0x48] sm:$0xff] }
  0x12   :  { %v669_v41 = vor.u32 %v810_v36, %v668_v35  ;;  %v808_v44 = vld [vmem:[#allocation2 + $0x24] sm:$0xf0]  ;;  %v673_v45 = vor.u32 %v809_v38, %v670_v39  ;;  %v807_v46 = vld [vmem:[#allocation2 + $0x24] sm:$0xf]  ;;  %v662_v47 = vld [vmem:[#allocation2 + $0x28] sm:$0xf0] }
  0x13   :  { %189 = vmatpush.bf16.msra.mxu0 %v791_v16  ;;  %318 = vmatpush.bf16.msra.mxu2 %v685_v26  ;;  %v787_v48 = vld [vmem:[%s1085_s1] sm:$0xff]  ;;  %v661_v49 = vor.u32 %v808_v44, %v660_v43  ;;  %v51_v52 = vld [vmem:[%s1084_s0 + $0x8] sm:$0xff]  ;;  %v665_v53 = vor.u32 %v807_v46, %v662_v47  ;;  %v652_v56 = vld [vmem:[#allocation2 + $0x10] sm:$0xf] }
  0x14   :  { %202 = vmatpush.bf16.msra.mxu1 %v799_v18  ;;  %331 = vmatpush.bf16.msra.mxu3 %v689_v29  ;;  %v795_v50 = vld [vmem:[%s1085_s1 + $0x40] sm:$0xff]  ;;  %v53_v55 = vpack.c.bf16 %v51_v52, %v51_v52  ;;  %v806_v57 = vld [vmem:[#allocation2 + $0x14] sm:$0xf0]  ;;  %v805_v58 = vld [vmem:[#allocation2 + $0x14] sm:$0xf] }
  0x15   :  { %v50_v51 = vld [vmem:[%s1084_s0] sm:$0xff]  ;;  %v653_v59 = vor.u32 %v806_v57, %v652_v56  ;;  %v654_v60 = vld [vmem:[#allocation2 + $0x18] sm:$0xf0]  ;;  %v804_v63 = vld [vmem:[#allocation2 + $0x4] sm:$0xf0] }
  0x16   :  { %v52_v54 = vpack.c.bf16 %v50_v51, %v50_v51  ;;  %v657_v61 = vor.u32 %v805_v58, %v654_v60  ;;  %v644_v62 = vld [vmem:[#allocation2] sm:$0xf]  ;;  %v803_v0 = vld [vmem:[#allocation2 + $0x4] sm:$0xf]  ;;  %v646_v2 = vld [vmem:[#allocation2 + $0x8] sm:$0xf0] }
  0x17   :  { %190 = vmatpush.bf16.msra.mxu0 %v790_v24  ;;  %319 = vmatpush.bf16.msra.mxu2 %v677_v33  ;;  %v645_v1 = vor.u32 %v804_v63, %v644_v62  ;;  %v649_v3 = vor.u32 %v803_v0, %v646_v2  ;;  %v826_v4 = vld [vmem:[%s1089_s5 + $0x38] sm:$0xff]  ;;  %v825_v6 = vld [vmem:[%s1089_s5 + $0x30] sm:$0xff]  ;;  %v824_v8 = vld [vmem:[%s1089_s5 + $0x28] sm:$0xff] }
  0x18   :  { %203 = vmatpush.bf16.msra.mxu1 %v798_v25  ;;  %332 = vmatpush.bf16.msra.mxu3 %v681_v37  ;;  %v834_v5 = vld [vmem:[%s1089_s5 + $0x78] sm:$0xff]  ;;  %v833_v7 = vld [vmem:[%s1089_s5 + $0x70] sm:$0xff]  ;;  %v832_v9 = vld [vmem:[%s1089_s5 + $0x68] sm:$0xff] }
  0x19   :  { %v823_v10 = vld [vmem:[%s1089_s5 + $0x20] sm:$0xff]  ;;  %v822_v12 = vld [vmem:[%s1089_s5 + $0x18] sm:$0xff]  ;;  %v821_v14 = vld [vmem:[%s1089_s5 + $0x10] sm:$0xff] }
  0x1a   :  { %v831_v11 = vld [vmem:[%s1089_s5 + $0x60] sm:$0xff]  ;;  %v830_v13 = vld [vmem:[%s1089_s5 + $0x58] sm:$0xff]  ;;  %v829_v15 = vld [vmem:[%s1089_s5 + $0x50] sm:$0xff] }
  0x1b   :  { %191 = vmatpush.bf16.msra.mxu0 %v789_v32  ;;  %320 = vmatpush.bf16.msra.mxu2 %v669_v41  ;;  %v843_v16 = vld [vmem:[%s1086_s2] ss:$0 sm:$0xff]  ;;  %v820_v25 = vld [vmem:[%s1089_s5 + $0x8] sm:$0xff]  ;;  %v838_v29 = vld [vmem:[%s1091_s7 + $0x18] sm:$0xff] }
  0x1c   :  { %204 = vmatpush.bf16.msra.mxu1 %v797_v34  ;;  %333 = vmatpush.bf16.msra.mxu3 %v673_v45  ;;  %v828_v26 = vld [vmem:[%s1089_s5 + $0x48] sm:$0xff]  ;;  %v819_v27 = vld [vmem:[%s1089_s5] sm:$0xff]  ;;  %v837_v30 = vld [vmem:[%s1091_s7 + $0x10] sm:$0xff] }
  0x1d   :  { %v827_v28 = vld [vmem:[%s1089_s5 + $0x40] sm:$0xff]  ;;  %v836_v44 = vld [vmem:[%s1091_s7 + $0x8] sm:$0xff] }
  0x1e   :  { %v230_v31 = vld [vmem:[%s1088_s4] sm:$0x3] }
  0x1f   :  { %192 = vmatpush.bf16.msra.mxu0 %v788_v40  ;;  %321 = vmatpush.bf16.msra.mxu2 %v661_v49  ;;  %v232_v32 = vperm.slane %v230_v31, 0  ;;  %v233_v33 = vperm.slane %v230_v31, 1  ;;  %v835_v45 = vld [vmem:[%s1091_s7] sm:$0xff]  ;;  %s901_s7 = smov [#allocation5]  }
  0x20   :  { %205 = vmatpush.bf16.msra.mxu1 %v796_v42  ;;  %334 = vmatpush.bf16.msra.mxu3 %v665_v53  ;;  %v844_v46 = vld [vmem:[%s1090_s6] ss:$0 sm:$0xff]  ;;  %s566_s26 = sshll.u32 %s901_s7, 4  ;;  %s568_s6 = sshll.u32 %s1093_s9, 4  ;;  %s567_s26 = int_to_ptr.vmem [resolvable:$true] %s566_s26  ;;  %s569_s6 = int_to_ptr.hbm [resolvable:$true] %s568_s6 }
  0x23   :  { %193 = vmatpush.bf16.msra.mxu0 %v787_v48  ;;  %322 = vmatpush.bf16.msra.mxu2 %v653_v59 }
  0x24   :  { %206 = vmatpush.bf16.msra.mxu1 %v795_v50  ;;  %335 = vmatpush.bf16.msra.mxu3 %v657_v61 }
  0x26   :  { %194 = vmatmul.bf16.vlgmr.msra.gmra.mxu0 %v52_v54 }
  0x27   :  { %207 = vmatmul.bf16.vlgmr.msra.gmra.mxu1 %v53_v55  ;;  %323 = vmatpush.bf16.msra.mxu2 %v645_v1  ;;  %v845_v55 = vld [vmem:[%s1092_s8] ss:$0 sm:$0xff] }
  0x28   :  { %336 = vmatpush.bf16.msra.mxu3 %v649_v3  ;;  %478 = vmatpush.bf16.msrb.mxu0 %v826_v4 }
  0x29   :  { %491 = vmatpush.bf16.msrb.mxu1 %v834_v5 }
  0x2b   :  { %550 = vmatpush.bf16.msrb.mxu2 %v838_v29 }
  0x2c   :  { %479 = vmatpush.bf16.msrb.mxu0 %v825_v6 }
  0x2d   :  { %492 = vmatpush.bf16.msrb.mxu1 %v833_v7 }
  0x2f   :  { %551 = vmatpush.bf16.msrb.mxu2 %v837_v30 }
  0x30   :  { %480 = vmatpush.bf16.msrb.mxu0 %v824_v8 }
  0x31   :  { %493 = vmatpush.bf16.msrb.mxu1 %v832_v9 }
  0x33   :  { %552 = vmatpush.bf16.msrb.mxu2 %v836_v44 }
  0x34   :  { %481 = vmatpush.bf16.msrb.mxu0 %v823_v10 }
  0x35   :  { %494 = vmatpush.bf16.msrb.mxu1 %v831_v11 }
  0x37   :  { %553 = vmatpush.bf16.msrb.mxu2 %v835_v45 }
  0x38   :  { %482 = vmatpush.bf16.msrb.mxu0 %v822_v12 }
  0x39   :  { %495 = vmatpush.bf16.msrb.mxu1 %v830_v13 }
  0x3c   :  { %483 = vmatpush.bf16.msrb.mxu0 %v821_v14 }
  0x3d   :  { %496 = vmatpush.bf16.msrb.mxu1 %v829_v15 }
  0x40   :  { %484 = vmatpush.bf16.msrb.mxu0 %v820_v25 }
  0x41   :  { %497 = vmatpush.bf16.msrb.mxu1 %v828_v26 }
  0x44   :  { %485 = vmatpush.bf16.msrb.mxu0 %v819_v27 }
  0x45   :  { %498 = vmatpush.bf16.msrb.mxu1 %v827_v28 }
  0xa3   :  { %v195_v17 = vpop.f32.mrf.mxu0 }
  0xa4   :  { %v208_v18 = vpop.f32.mrf.mxu1  ;;  %v196_v19 = vadd.f32 %v843_v16, %v195_v17 }
  0xa6   :  { %v209_v20 = vadd.f32 %v208_v18, %v196_v19 }
  0xa8   :  { %v212_v21 = vmax.f32 %v209_v20, 0.0 }
  0xaa   :  { %v213_v22 = vpack.c.bf16 %v212_v21, %v212_v21 }
  0xab   :  { %v197_v23 = vpop.f32.mrf.mxu0 }
  0xac   :  { %v210_v24 = vpop.f32.mrf.mxu1  ;;  %324 = vmatmul.bf16.vlgmr.msra.gmra.mxu2 %v213_v22  ;;  %337 = vmatmul.bf16.vlgmr.msra.gmra.mxu3 %v213_v22 }
 0x12f   :  { %v325_v34 = vpop.f32.mrf.mxu2  ;;  %v338_v35 = vpop.f32.mrf.mxu3 }
 0x130   :  { %v326_v36 = vadd.f32 %v325_v34, %v232_v32  ;;  %v339_v37 = vadd.f32 %v338_v35, %v233_v33 }
 0x132   :  { %v342_v38 = vmax.f32 %v326_v36, 0.0  ;;  %v343_v39 = vmax.f32 %v339_v37, 0.0 }
 0x134   :  { %v344_v40 = vpack.c.bf16 %v342_v38, %v342_v38  ;;  %v345_v41 = vpack.c.bf16 %v343_v39, %v343_v39 }
 0x136   :  { %486 = vmatmul.bf16.vlgmr.msrb.gmra.mxu0 %v344_v40  ;;  %499 = vmatmul.bf16.vlgmr.msrb.gmra.mxu1 %v345_v41 }
 0x137   :  { %v327_v42 = vpop.f32.mrf.mxu2  ;;  %v340_v43 = vpop.f32.mrf.mxu3 }
 0x1b3   :  { %v487_v47 = vpop.f32.mrf.mxu0  ;;  %v500_v48 = vpop.f32.mrf.mxu1 }
 0x1b4   :  { %v488_v49 = vadd.f32 %v844_v46, %v487_v47 }
 0x1b6   :  { %v501_v50 = vadd.f32 %v500_v48, %v488_v49 }
 0x1b8   :  { %v504_v51 = vmax.f32 %v501_v50, 0.0 }
 0x1ba   :  { %v505_v52 = vpack.c.bf16 %v504_v51, %v504_v51 }
 0x1bb   :  { %v489_v53 = vpop.f32.mrf.mxu0  ;;  %v502_v54 = vpop.f32.mrf.mxu1 }
 0x1bc   :  { %786 = vmatmul.msk.bf16.vlgmr.msrb.gmra.mxu2 %vm542_vm0, %v505_v52 }
 0x23f   :  { %v555_v56 = vpop.f32.mrf.mxu2 }
 0x240   :  { %v556_v57 = vadd.f32 %v845_v55, %v555_v56 }
 0x242   :  { %v559_v58 = vpack.c.bf16 %v556_v57, %v556_v57 }
 0x244   :  { %560 = vst [vmem:[#allocation5] sm:$0xf] %v559_v58 }
 0x245   :  { %571 = dma.vmem_to_hbm [thread:$0]  %s567_s26, 64, %s569_s6, [#allocation4]  }
 0x247   :  { %v557_v59 = vpop.f32.mrf.mxu2 }
 0x248   :  { %896 = dma.done.wait [#allocation4], 64  }
 0x249   :  { %897 = vsyncadd [#allocation4], 4294967232 }
 0x24a   :  { %576 = vsyncpa [#allocation3], 1 }
 0x24b   :  { %577 = vsyncpa [#allocation4], 1 }

</bundles_post_ra>
